<compile_context>
chip_gen: v7x
topology: tpu7x:2x2x1
jax: 0.10.0
libtpu: 0.0.40
codegen_flags: <defaults>
</compile_context>

<pallas_src>
import functools

import jax
import jax.numpy as jnp
from jax.experimental import pallas as pl
from jax.experimental.pallas import tpu as pltpu


def _round_up(x, m):
    return (x + m - 1) // m * m


def _matmul_bias_relu_kernel(p_ref, w_ref, b_ref, o_ref, *, cout):
    """One grid step = one M tile of the im2col GEMM.

    p_ref: (TILE_M, K_pad)        im2col patch rows (lane dense)
    w_ref: (K_pad, COUT_pad)      BN-scale-folded weights (lane dense, resident)
    b_ref: (1, COUT_pad)          folded BN bias (f32, resident)
    o_ref: (TILE_M, COUT)         compact output tile (real channels only)
    """
    acc = jnp.dot(p_ref[...], w_ref[...], preferred_element_type=jnp.float32)
    y = jnp.maximum(acc + b_ref[...], 0.0)
    # Store only the real channels: avoids 128/COUT x HBM writeback + a
    # post-kernel slice pass when COUT << 128 (no-op when COUT is 128-aligned).
    o_ref[...] = y[:, :cout].astype(o_ref.dtype)


@functools.partial(jax.jit, static_argnames=("padding", "stride", "eps",
                                             "compute_dtype", "tile_m"))
def basic_conv2d(x_nchw, weight_oihw, gamma, beta, running_mean, running_var,
                 *, padding=1, stride=1, eps=1e-3, compute_dtype=None,
                 tile_m=256):
    """Fused Conv2d(bias=False) + BatchNorm2d(eps, inference stats) + ReLU."""
    N, CIN, H, W = x_nchw.shape
    COUT, CIN_w, KH, KW = weight_oihw.shape
    assert CIN == CIN_w
    out_dtype = x_nchw.dtype
    cdt = out_dtype if compute_dtype is None else compute_dtype

    Hp, Wp = H + 2 * padding, W + 2 * padding
    OH = (Hp - KH) // stride + 1
    OW = (Wp - KW) // stride + 1

    M = N * OH * OW
    K = KH * KW * CIN
    K_PAD = _round_up(K, 128)
    COUT_PAD = _round_up(COUT, 128)
    TILE_M = min(tile_m, _round_up(M, 8))
    M_PAD = _round_up(M, TILE_M)

    # ---- wrapper-side im2col (XLA): trades extra activation HBM bytes for a
    # ---- single-matmul kernel body with zero in-kernel gather work.
    # TODO(synk): in a full NHWC network, keep NHWC end-to-end and fuse the
    # im2col halo into the kernel for large feature maps.
    x_nhwc = jnp.transpose(x_nchw, (0, 2, 3, 1))
    x_pad = jnp.pad(x_nhwc, ((0, 0), (padding, padding), (padding, padding), (0, 0)))
    taps = []
    for kh in range(KH):
        for kw in range(KW):
            taps.append(jax.lax.slice(
                x_pad,
                (0, kh, kw, 0),
                (N, kh + (OH - 1) * stride + 1, kw + (OW - 1) * stride + 1, CIN),
                (1, stride, stride, 1)))
    patch = jnp.concatenate(taps, axis=-1)               # (N, OH, OW, KH*KW*CIN)
    patch2d = patch.reshape(M, K)
    patch2d = jnp.pad(patch2d, ((0, M_PAD - M), (0, K_PAD - K))).astype(cdt)

    # ---- fold BN (inference running stats) into the conv weights / bias ----
    inv_std = jax.lax.rsqrt(running_var.astype(jnp.float32) + eps)
    scale = gamma.astype(jnp.float32) * inv_std                              # (COUT,)
    bias = beta.astype(jnp.float32) - running_mean.astype(jnp.float32) * scale

    w_hwio = jnp.transpose(weight_oihw, (2, 3, 1, 0)).astype(jnp.float32)    # (KH,KW,CIN,COUT)
    w2d = (w_hwio * scale[None, None, None, :]).reshape(K, COUT)
    w2d = jnp.pad(w2d, ((0, K_PAD - K), (0, COUT_PAD - COUT))).astype(cdt)   # lane dense
    bias_pad = jnp.pad(bias, (0, COUT_PAD - COUT)).reshape(1, COUT_PAD)

    kernel = functools.partial(_matmul_bias_relu_kernel, cout=COUT)

    out2d = pl.pallas_call(
        kernel,
        out_shape=jax.ShapeDtypeStruct((M_PAD, COUT), out_dtype),
        grid_spec=pltpu.PrefetchScalarGridSpec(
            num_scalar_prefetch=0,
            grid=(M_PAD // TILE_M,),
            in_specs=[
                # patch rows: one lane-dense tile per grid step
                pl.BlockSpec((TILE_M, K_PAD), lambda i: (i, 0)),
                # weights / bias: constant block index -> VMEM resident
                pl.BlockSpec((K_PAD, COUT_PAD), lambda i: (0, 0)),
                pl.BlockSpec((1, COUT_PAD), lambda i: (0, 0)),
            ],
            out_specs=pl.BlockSpec((TILE_M, COUT), lambda i: (i, 0)),
        ),
        compiler_params=pltpu.CompilerParams(
            dimension_semantics=("parallel",),
        ),
    )(patch2d, w2d, bias_pad)

    out = out2d[:M].reshape(N, OH, OW, COUT)
    # NHWC -> NCHW to match the PyTorch module's convention.
    return jnp.transpose(out, (0, 3, 1, 2))


def _reference(x_nchw, weight_oihw, gamma, beta, running_mean, running_var,
               *, padding=1, eps=1e-3):
    x_nhwc = jnp.transpose(x_nchw, (0, 2, 3, 1))
    w_hwio = jnp.transpose(weight_oihw, (2, 3, 1, 0))
    y = jax.lax.conv_general_dilated(
        x_nhwc, w_hwio, window_strides=(1, 1),
        padding=[(padding, padding), (padding, padding)],
        dimension_numbers=("NHWC", "HWIO", "NHWC"))
    inv_std = jax.lax.rsqrt(running_var + eps)
    y = (y - running_mean) * inv_std * gamma + beta
    y = jnp.maximum(y, 0.0)
    return jnp.transpose(y, (0, 3, 1, 2))


if __name__ == "__main__":
    # Shapes consistent with BasicConv2d(in_channels=4, out_channels=8,
    # kernel_size=3, padding=1) applied to a (2, 4, 16, 16) NCHW input.
    N, CIN, H, W = 2, 4, 16, 16
    COUT, KSZ, PAD = 8, 3, 1

    key = jax.random.PRNGKey(0)
    kx, kwt, kg, kb, km, kv = jax.random.split(key, 6)

    x = jax.random.normal(kx, (N, CIN, H, W), dtype=jnp.float32)
    weight = jax.random.normal(kwt, (COUT, CIN, KSZ, KSZ), dtype=jnp.float32) * 0.1
    gamma = jax.random.normal(kg, (COUT,), dtype=jnp.float32) * 0.1 + 1.0
    beta = jax.random.normal(kb, (COUT,), dtype=jnp.float32) * 0.1
    running_mean = jax.random.normal(km, (COUT,), dtype=jnp.float32) * 0.1
    running_var = jax.random.uniform(kv, (COUT,), dtype=jnp.float32,
                                     minval=0.5, maxval=1.5)

    ref = _reference(x, weight, gamma, beta, running_mean, running_var,
                     padding=PAD, eps=1e-3)

    # f32 compute path (matches PyTorch numerics tightly).
    out = basic_conv2d(x, weight, gamma, beta, running_mean, running_var,
                       padding=PAD, eps=1e-3)
    out = jax.block_until_ready(out)
    assert out.shape == (N, COUT, H, W)
    assert jnp.allclose(out, ref, atol=1e-4, rtol=1e-4)

    # bf16 MXU path (halved HBM/DMA bytes, full-rate MXU on v6e/v7x);
    # f32 accumulation + f32 epilogue.
    out_bf16 = basic_conv2d(x, weight, gamma, beta, running_mean, running_var,
                            padding=PAD, eps=1e-3, compute_dtype=jnp.bfloat16)
    out_bf16 = jax.block_until_ready(out_bf16)
    assert jnp.allclose(out_bf16, ref, atol=5e-2, rtol=5e-2)

    print("KERNEL_OK")
</pallas_src>

<mosaic_0001>
module attributes {stable_mosaic.version = 11 : i64} {
  func.func @_matmul_bias_relu_kernel(%arg0: i32, %arg1: memref<256x128xf32, #tpu.memory_space<vmem>>, %arg2: memref<128x128xf32, #tpu.memory_space<vmem>>, %arg3: memref<1x128xf32, #tpu.memory_space<vmem>>, %arg4: memref<256x8xf32, #tpu.memory_space<vmem>>) attributes {dimension_semantics = [#tpu.dimension_semantics<parallel>], iteration_bounds = array<i64: 2>, scalar_prefetch = 0 : i64, scratch_operands = 0 : i64, tpu.core_type = #tpu.core_type<tc>, window_params = [{transform_indices = @transform_0, window_bounds = array<i64: 256, 128>}, {pipeline_mode = #tpu.pipeline_mode<synchronous>, transform_indices = @transform_1, window_bounds = array<i64: 128, 128>}, {pipeline_mode = #tpu.pipeline_mode<synchronous>, transform_indices = @transform_2, window_bounds = array<i64: 1, 128>}, {transform_indices = @transform_3, window_bounds = array<i64: 256, 8>}]} {
    %c0 = arith.constant 0 : index
    %c0_0 = arith.constant 0 : index
    %0 = vector.load %arg1[%c0, %c0_0] : memref<256x128xf32, #tpu.memory_space<vmem>>, vector<256x128xf32>
    %c0_1 = arith.constant 0 : index
    %c0_2 = arith.constant 0 : index
    %1 = vector.load %arg2[%c0_1, %c0_2] : memref<128x128xf32, #tpu.memory_space<vmem>>, vector<128x128xf32>
    %cst = arith.constant dense<0.000000e+00> : vector<256x128xf32>
    %2 = tpu.matmul %0, %1, %cst {dimension_numbers = #tpu.dot_dimension_numbers<[1], [0], [0], [1], [0, 0, 1, 1], [], []>} : vector<256x128xf32>, vector<128x128xf32>, vector<256x128xf32> -> vector<256x128xf32>
    %c0_3 = arith.constant 0 : index
    %c0_4 = arith.constant 0 : index
    %3 = vector.load %arg3[%c0_3, %c0_4] : memref<1x128xf32, #tpu.memory_space<vmem>>, vector<1x128xf32>
    %4 = vector.broadcast %3 : vector<1x128xf32> to vector<256x128xf32>
    %5 = arith.addf %2, %4 : vector<256x128xf32>
    %cst_5 = arith.constant 0.000000e+00 : f32
    %6 = vector.broadcast %cst_5 : f32 to vector<256x128xf32>
    %7 = arith.maximumf %5, %6 : vector<256x128xf32>
    %8 = vector.extract_strided_slice %7 {offsets = [0, 0], sizes = [256, 8], strides = [1, 1]} : vector<256x128xf32> to vector<256x8xf32>
    %c0_6 = arith.constant 0 : index
    %c0_7 = arith.constant 0 : index
    %9 = vector.load %arg4[%c0_6, %c0_7] : memref<256x8xf32, #tpu.memory_space<vmem>>, vector<256x8xf32>
    tpu.vector_store %arg4[%c0_6, %c0_7], %8 {strides = array<i32>} : memref<256x8xf32, #tpu.memory_space<vmem>>, vector<256x8xf32>,
    return
  }
  func.func @transform_0(%arg0: i32) -> (i32, i32) {
    %c0_i32 = arith.constant 0 : i32
    %c0_i32_0 = arith.constant 0 : i32
    return %arg0, %c0_i32 : i32, i32
  }
  func.func @transform_1(%arg0: i32) -> (i32, i32) {
    %c0_i32 = arith.constant 0 : i32
    %c0_i32_0 = arith.constant 0 : i32
    %c0_i32_1 = arith.constant 0 : i32
    return %c0_i32, %c0_i32_0 : i32, i32
  }
  func.func @transform_2(%arg0: i32) -> (i32, i32) {
    %c0_i32 = arith.constant 0 : i32
    %c0_i32_0 = arith.constant 0 : i32
    %c0_i32_1 = arith.constant 0 : i32
    return %c0_i32, %c0_i32_0 : i32, i32
  }
  func.func @transform_3(%arg0: i32) -> (i32, i32) {
    %c0_i32 = arith.constant 0 : i32
    %c0_i32_0 = arith.constant 0 : i32
    return %arg0, %c0_i32 : i32, i32
  }
}

</mosaic_0001>

<bundles_post_ra>
// kernel: basic_conv2d.1
= control target key start
LH: loop header
LB: loop body
LE: loop exit
PB: predicated region body
PF: predicated region fallthrough
CT: control target
= control target key end

     0   :  { %s799_s12 = smov 0   ;;  %s1008_s0 = inlined_call_operand.vmem [shape: f32[512,128], index: 0, kind: input, shape index: {}]   ;;  %s1009_s1 = inlined_call_operand.vmem [shape: f32[128,128], index: 1, kind: input, shape index: {}]   ;;  %s1010_s2 = inlined_call_operand.vmem [shape: f32[1,128], index: 2, kind: input, shape index: {}]   ;;  %s1011_s3 = inlined_call_operand.vmem [shape: f32[512,8], index: 3, kind: output, shape index: {}]  }
   0x1 LB: > { %s575_s13 = sadd.s32 4294967295, %s777_s12   ;;  %p579_p0 = scmp.ge.s32.totalorder %s777_s12, 1  ;;  %s777_s12 = sphi %s799_s12, %s13_s12  }
   0x2   : > { %p138_p1 = scmp.lt.s32.totalorder %s777_s12, 3 }
   0x4   : > { %p139_p2 = pnand %p579_p0, %p138_p1 }
   0x5   : > { %v206_v0 = vld [vmem:[%s1009_s1] sm:$0xff] (!%p139_p2)  ;;  %v207_v1 = vld [vmem:[%s1009_s1 + $0x8] sm:$0xff] (!%p139_p2)  ;;  %v208_v2 = vld [vmem:[%s1009_s1 + $0x10] sm:$0xff] (!%p139_p2)  ;;  %s580_s20 = sshll.u32 (!%p139_p2), %s575_s13, 5  ;;  %vm486_vm0 = vcmask (!%p139_p2), 64512  }
   0x6   : > { %142 = sbr.rel (%p139_p2) target bundleno = 287 (0x11f), region = 32  ;;  %v715_v3 = vpack.c.bf16 (!%p139_p2), %v207_v1, %v206_v0  ;;  %v209_v4 = vld [vmem:[%s1009_s1 + $0x18] sm:$0xff] (!%p139_p2)  ;;  %p163_p3 = scmp.lt.s32.totalorder (!%p139_p2), %s580_s20, 63  ;;  %v210_v6 = vld [vmem:[%s1009_s1 + $0x20] sm:$0xff] (!%p139_p2)  ;;  %v211_v7 = vld [vmem:[%s1009_s1 + $0x28] sm:$0xff] (!%p139_p2) }
   0x7   : > { %v719_v5 = vpack.c.bf16 (!%p139_p2), %v209_v4, %v208_v2  ;;  %v723_v8 = vpack.c.bf16 (!%p139_p2), %v211_v7, %v210_v6  ;;  %v212_v9 = vld [vmem:[%s1009_s1 + $0x30] sm:$0xff] (!%p139_p2)  ;;  %v213_v10 = vld [vmem:[%s1009_s1 + $0x38] sm:$0xff] (!%p139_p2)  ;;  %v214_v14 = vld [vmem:[%s1009_s1 + $0x40] sm:$0xff] (!%p139_p2) }
   0x8   : > { %716 = vmatprep.subr.bf16.mxu0 (!%p139_p2), %v715_v3  ;;  %747 = vmatprep.subr.bf16.mxu1 (!%p139_p2), %v715_v3  ;;  %v727_v13 = vpack.c.bf16 (!%p139_p2), %v213_v10, %v212_v9  ;;  %v215_v15 = vld [vmem:[%s1009_s1 + $0x48] sm:$0xff] (!%p139_p2)  ;;  %v216_v17 = vld [vmem:[%s1009_s1 + $0x50] sm:$0xff] (!%p139_p2)  ;;  %v217_v18 = vld [vmem:[%s1009_s1 + $0x58] sm:$0xff] (!%p139_p2) }
   0x9   : > { %718 = vmatpush3.bf16.msra.mxu0 (!%p139_p2), %v715_v3  ;;  %755 = vmatpush3.bf16.msra.mxu1 (!%p139_p2), %v715_v3  ;;  %v731_v16 = vpack.c.bf16 (!%p139_p2), %v215_v15, %v214_v14  ;;  %v735_v19 = vpack.c.bf16 (!%p139_p2), %v217_v18, %v216_v17  ;;  %v218_v20 = vld [vmem:[%s1009_s1 + $0x60] sm:$0xff] (!%p139_p2)  ;;  %v219_v21 = vld [vmem:[%s1009_s1 + $0x68] sm:$0xff] (!%p139_p2)  ;;  %v220_v23 = vld [vmem:[%s1009_s1 + $0x70] sm:$0xff] (!%p139_p2) }
   0xa   : > { %720 = vmatprep.subr.bf16.mxu0 (!%p139_p2), %v719_v5  ;;  %748 = vmatprep.subr.bf16.mxu1 (!%p139_p2), %v719_v5  ;;  %v739_v22 = vpack.c.bf16 (!%p139_p2), %v219_v21, %v218_v20  ;;  %v221_v24 = vld [vmem:[%s1009_s1 + $0x78] sm:$0xff] (!%p139_p2)  ;;  %v900_v56 = vld [vmem:[%s1010_s2] ss:$0 sm:$0xff] (!%p139_p2) }
   0xb   : > { %v743_v25 = vpack.c.bf16 (!%p139_p2), %v221_v24, %v220_v23 }
   0xd   : > { %s1013_s20 = smov (!%p163_p3, %s580_s20), 63  ;;  %722 = vmatpush3.bf16.msra.mxu0 %v719_v5  ;;  %756 = vmatpush3.bf16.msra.mxu1 %v719_v5 }
   0xe   : > { %s581_s27 = sshll.u32 %s1013_s20, 3  ;;  %724 = vmatprep.subr.bf16.mxu0 %v723_v8  ;;  %749 = vmatprep.subr.bf16.mxu1 %v723_v8 }
   0xf   : > { %s839_s7 = scalar_lea.vmem %s1008_s0, %s581_s27  ;;  %s909_s4 = scalar_lea.vmem %s1011_s3, %s581_s27 }
  0x10   : > { %v174_v11 = vld [vmem:[%s839_s7] sm:$0xff]  ;;  %v175_v26 = vld [vmem:[%s839_s7 + $0x8] sm:$0xff]  ;;  %v176_v28 = vld [vmem:[%s839_s7 + $0x10] sm:$0xff] }
  0x11   : > { %v190_v12 = vld [vmem:[%s839_s7 + $0x80] sm:$0xff]  ;;  %667 = vmatprep.mubr.f32.mxu0 %v174_v11  ;;  %726 = vmatpush3.bf16.msra.mxu0 %v723_v8  ;;  %v191_v27 = vld [vmem:[%s839_s7 + $0x88] sm:$0xff]  ;;  %v192_v29 = vld [vmem:[%s839_s7 + $0x90] sm:$0xff] }
  0x12   : > { %691 = vmatprep.mubr.f32.mxu1 %v190_v12  ;;  %757 = vmatpush3.bf16.msra.mxu1 %v723_v8  ;;  %v177_v30 = vld [vmem:[%s839_s7 + $0x18] sm:$0xff]  ;;  %v178_v32 = vld [vmem:[%s839_s7 + $0x20] sm:$0xff]  ;;  %v179_v34 = vld [vmem:[%s839_s7 + $0x28] sm:$0xff] }
  0x13   : > { %728 = vmatprep.subr.bf16.mxu0 %v727_v13  ;;  %750 = vmatprep.subr.bf16.mxu1 %v727_v13  ;;  %v193_v31 = vld [vmem:[%s839_s7 + $0x98] sm:$0xff]  ;;  %v194_v33 = vld [vmem:[%s839_s7 + $0xa0] sm:$0xff]  ;;  %v195_v35 = vld [vmem:[%s839_s7 + $0xa8] sm:$0xff] }
  0x14   : > { %v180_v36 = vld [vmem:[%s839_s7 + $0x30] sm:$0xff]  ;;  %v181_v38 = vld [vmem:[%s839_s7 + $0x38] sm:$0xff]  ;;  %v182_v40 = vld [vmem:[%s839_s7 + $0x40] sm:$0xff] }
  0x15   : > { %730 = vmatpush3.bf16.msra.mxu0 %v727_v13  ;;  %v196_v37 = vld [vmem:[%s839_s7 + $0xb0] sm:$0xff]  ;;  %v197_v39 = vld [vmem:[%s839_s7 + $0xb8] sm:$0xff]  ;;  %v198_v41 = vld [vmem:[%s839_s7 + $0xc0] sm:$0xff] }
  0x16   : > { %758 = vmatpush3.bf16.msra.mxu1 %v727_v13  ;;  %732 = vmatprep.subr.bf16.mxu0 %v731_v16  ;;  %v183_v42 = vld [vmem:[%s839_s7 + $0x48] sm:$0xff]  ;;  %v184_v44 = vld [vmem:[%s839_s7 + $0x50] sm:$0xff]  ;;  %v185_v46 = vld [vmem:[%s839_s7 + $0x58] sm:$0xff] }
  0x17   : > { %751 = vmatprep.subr.bf16.mxu1 %v731_v16  ;;  %v199_v43 = vld [vmem:[%s839_s7 + $0xc8] sm:$0xff]  ;;  %v200_v45 = vld [vmem:[%s839_s7 + $0xd0] sm:$0xff]  ;;  %v201_v47 = vld [vmem:[%s839_s7 + $0xd8] sm:$0xff] }
  0x18   : > { %v186_v48 = vld [vmem:[%s839_s7 + $0x60] sm:$0xff]  ;;  %v187_v50 = vld [vmem:[%s839_s7 + $0x68] sm:$0xff]  ;;  %v188_v52 = vld [vmem:[%s839_s7 + $0x70] sm:$0xff] }
  0x19   : > { %734 = vmatpush3.bf16.msra.mxu0 %v731_v16  ;;  %v202_v49 = vld [vmem:[%s839_s7 + $0xe0] sm:$0xff]  ;;  %v203_v51 = vld [vmem:[%s839_s7 + $0xe8] sm:$0xff]  ;;  %v204_v53 = vld [vmem:[%s839_s7 + $0xf0] sm:$0xff] }
  0x1a   : > { %759 = vmatpush3.bf16.msra.mxu1 %v731_v16  ;;  %736 = vmatprep.subr.bf16.mxu0 %v735_v19  ;;  %v189_v54 = vld [vmem:[%s839_s7 + $0x78] sm:$0xff] }
  0x1b   : > { %752 = vmatprep.subr.bf16.mxu1 %v735_v19  ;;  %v205_v55 = vld [vmem:[%s839_s7 + $0xf8] sm:$0xff] }
  0x1d   : > { %738 = vmatpush3.bf16.msra.mxu0 %v735_v19 }
  0x1e   : > { %760 = vmatpush3.bf16.msra.mxu1 %v735_v19  ;;  %740 = vmatprep.subr.bf16.mxu0 %v739_v22 }
  0x1f   : > { %753 = vmatprep.subr.bf16.mxu1 %v739_v22 }
  0x21   : > { %742 = vmatpush3.bf16.msra.mxu0 %v739_v22 }
  0x22   : > { %761 = vmatpush3.bf16.msra.mxu1 %v739_v22  ;;  %744 = vmatprep.subr.bf16.mxu0 %v743_v25 }
  0x23   : > { %754 = vmatprep.subr.bf16.mxu1 %v743_v25 }
  0x25   : > { %746 = vmatpush3.bf16.msra.mxu0 %v743_v25 }
  0x26   : > { %762 = vmatpush3.bf16.msra.mxu1 %v743_v25 }
  0x28   : > { %668 = vmatmul.mubr.f32.vlgmr.msra.gmra.mrb[0].mxu0 %v175_v26 }
  0x29   : > { %692 = vmatmul.mubr.f32.vlgmr.msra.gmra.mrb[0].mxu1 %v191_v27  ;;  %670 = vmatprep.mubr.f32.mxu0 %v176_v28 }
  0x2a   : > { %694 = vmatprep.mubr.f32.mxu1 %v192_v29 }
  0x2c   : > { %671 = vmatmul.mubr.f32.gmra.mrb[2].mxu0 %v177_v30 }
  0x2d   : > { %695 = vmatmul.mubr.f32.gmra.mrb[2].mxu1 %v193_v31  ;;  %673 = vmatprep.mubr.f32.mxu0 %v178_v32 }
  0x2e   : > { %697 = vmatprep.mubr.f32.mxu1 %v194_v33 }
  0x30   : > { %674 = vmatmul.mubr.f32.gmra.mrb[4].mxu0 %v179_v34 }
  0x31   : > { %698 = vmatmul.mubr.f32.gmra.mrb[4].mxu1 %v195_v35  ;;  %676 = vmatprep.mubr.f32.mxu0 %v180_v36 }
  0x32   : > { %700 = vmatprep.mubr.f32.mxu1 %v196_v37 }
  0x34   : > { %677 = vmatmul.mubr.f32.gmra.mrb[6].mxu0 %v181_v38 }
  0x35   : > { %701 = vmatmul.mubr.f32.gmra.mrb[6].mxu1 %v197_v39  ;;  %679 = vmatprep.mubr.f32.mxu0 %v182_v40 }
  0x36   : > { %703 = vmatprep.mubr.f32.mxu1 %v198_v41 }
  0x38   : > { %680 = vmatmul.mubr.f32.gmra.mrb[8].mxu0 %v183_v42 }
  0x39   : > { %704 = vmatmul.mubr.f32.gmra.mrb[8].mxu1 %v199_v43  ;;  %682 = vmatprep.mubr.f32.mxu0 %v184_v44 }
  0x3a   : > { %706 = vmatprep.mubr.f32.mxu1 %v200_v45 }
  0x3c   : > { %683 = vmatmul.mubr.f32.gmra.mrb[10].mxu0 %v185_v46 }
  0x3d   : > { %707 = vmatmul.mubr.f32.gmra.mrb[10].mxu1 %v201_v47  ;;  %685 = vmatprep.mubr.f32.mxu0 %v186_v48 }
  0x3e   : > { %709 = vmatprep.mubr.f32.mxu1 %v202_v49 }
  0x40   : > { %686 = vmatmul.mubr.f32.gmra.mrb[12].mxu0 %v187_v50 }
  0x41   : > { %710 = vmatmul.mubr.f32.gmra.mrb[12].mxu1 %v203_v51  ;;  %688 = vmatprep.mubr.f32.mxu0 %v188_v52 }
  0x42   : > { %712 = vmatprep.mubr.f32.mxu1 %v204_v53 }
  0x44   : > { %689 = vmatmul.mubr.f32.gmra.mrb[14].mxu0 %v189_v54 }
  0x45   : > { %713 = vmatmul.mubr.f32.gmra.mrb[14].mxu1 %v205_v55 }
  0xfb   : > { %v669_v57 = vpop.f32.mrb[0].mxu0 }
  0xfc   : > { %v693_v58 = vpop.f32.mrb[0].mxu1  ;;  %v301_v59 = vadd.f32 %v669_v57, %v900_v56  ;;  %v295_v61 = vpop.f32.mrb[1].mxu0 }
  0xfd   : > { %v381_v60 = vadd.f32 %v693_v58, %v900_v56  ;;  %v375_v62 = vpop.f32.mrb[1].mxu1  ;;  %v296_v63 = vadd.f32 %v900_v56, %v295_v61 }
  0xfe   : > { %v376_v0 = vadd.f32 %v900_v56, %v375_v62  ;;  %v455_v1 = vmax.f32 %v301_v59, 0.0 }
  0xff   : > { %v471_v2 = vmax.f32 %v381_v60, 0.0  ;;  %v454_v3 = vmax.f32 %v296_v63, 0.0  ;;  %v672_v5 = vpop.f32.mrb[2].mxu0 }
 0x100   : > { %v470_v4 = vmax.f32 %v376_v0, 0.0  ;;  %v696_v6 = vpop.f32.mrb[2].mxu1  ;;  %488 = vst.msk [vmem:[%s909_s4 + $0x8] sm:$0xff] %vm486_vm0, %v455_v1  ;;  %v311_v7 = vadd.f32 %v672_v5, %v900_v56  ;;  %v305_v9 = vpop.f32.mrb[3].mxu0 }
 0x101   : > { %504 = vst.msk [vmem:[%s909_s4 + $0x88] sm:$0xff] %vm486_vm0, %v471_v2  ;;  %v391_v8 = vadd.f32 %v696_v6, %v900_v56  ;;  %v385_v10 = vpop.f32.mrb[3].mxu1  ;;  %487 = vst.msk [vmem:[%s909_s4] sm:$0xff] %vm486_vm0, %v454_v3  ;;  %v306_v11 = vadd.f32 %v900_v56, %v305_v9 }
 0x102   : > { %503 = vst.msk [vmem:[%s909_s4 + $0x80] sm:$0xff] %vm486_vm0, %v470_v4  ;;  %v386_v12 = vadd.f32 %v900_v56, %v385_v10  ;;  %v457_v13 = vmax.f32 %v311_v7, 0.0 }
 0x103   : > { %v473_v14 = vmax.f32 %v391_v8, 0.0  ;;  %v456_v15 = vmax.f32 %v306_v11, 0.0  ;;  %v675_v17 = vpop.f32.mrb[4].mxu0 }
 0x104   : > { %v472_v16 = vmax.f32 %v386_v12, 0.0  ;;  %v699_v18 = vpop.f32.mrb[4].mxu1  ;;  %490 = vst.msk [vmem:[%s909_s4 + $0x18] sm:$0xff] %vm486_vm0, %v457_v13  ;;  %v321_v19 = vadd.f32 %v675_v17, %v900_v56  ;;  %v315_v21 = vpop.f32.mrb[5].mxu0 }
 0x105   : > { %506 = vst.msk [vmem:[%s909_s4 + $0x98] sm:$0xff] %vm486_vm0, %v473_v14  ;;  %v401_v20 = vadd.f32 %v699_v18, %v900_v56  ;;  %v395_v22 = vpop.f32.mrb[5].mxu1  ;;  %489 = vst.msk [vmem:[%s909_s4 + $0x10] sm:$0xff] %vm486_vm0, %v456_v15  ;;  %v316_v23 = vadd.f32 %v900_v56, %v315_v21 }
 0x106   : > { %505 = vst.msk [vmem:[%s909_s4 + $0x90] sm:$0xff] %vm486_vm0, %v472_v16  ;;  %v396_v24 = vadd.f32 %v900_v56, %v395_v22  ;;  %v459_v25 = vmax.f32 %v321_v19, 0.0 }
 0x107   : > { %v475_v26 = vmax.f32 %v401_v20, 0.0  ;;  %v458_v27 = vmax.f32 %v316_v23, 0.0  ;;  %v678_v29 = vpop.f32.mrb[6].mxu0 }
 0x108   : > { %v474_v28 = vmax.f32 %v396_v24, 0.0  ;;  %v702_v30 = vpop.f32.mrb[6].mxu1  ;;  %492 = vst.msk [vmem:[%s909_s4 + $0x28] sm:$0xff] %vm486_vm0, %v459_v25  ;;  %v331_v31 = vadd.f32 %v678_v29, %v900_v56  ;;  %v325_v33 = vpop.f32.mrb[7].mxu0 }
 0x109   : > { %508 = vst.msk [vmem:[%s909_s4 + $0xa8] sm:$0xff] %vm486_vm0, %v475_v26  ;;  %v411_v32 = vadd.f32 %v702_v30, %v900_v56  ;;  %v405_v34 = vpop.f32.mrb[7].mxu1  ;;  %491 = vst.msk [vmem:[%s909_s4 + $0x20] sm:$0xff] %vm486_vm0, %v458_v27  ;;  %v326_v35 = vadd.f32 %v900_v56, %v325_v33 }
 0x10a   : > { %507 = vst.msk [vmem:[%s909_s4 + $0xa0] sm:$0xff] %vm486_vm0, %v474_v28  ;;  %v406_v36 = vadd.f32 %v900_v56, %v405_v34  ;;  %v461_v37 = vmax.f32 %v331_v31, 0.0 }
 0x10b   : > { %v477_v38 = vmax.f32 %v411_v32, 0.0  ;;  %v460_v39 = vmax.f32 %v326_v35, 0.0  ;;  %v681_v41 = vpop.f32.mrb[8].mxu0 }
 0x10c   : > { %v476_v40 = vmax.f32 %v406_v36, 0.0  ;;  %v705_v42 = vpop.f32.mrb[8].mxu1  ;;  %494 = vst.msk [vmem:[%s909_s4 + $0x38] sm:$0xff] %vm486_vm0, %v461_v37  ;;  %v341_v43 = vadd.f32 %v681_v41, %v900_v56  ;;  %v335_v45 = vpop.f32.mrb[9].mxu0 }
 0x10d   : > { %510 = vst.msk [vmem:[%s909_s4 + $0xb8] sm:$0xff] %vm486_vm0, %v477_v38  ;;  %v421_v44 = vadd.f32 %v705_v42, %v900_v56  ;;  %v415_v46 = vpop.f32.mrb[9].mxu1  ;;  %493 = vst.msk [vmem:[%s909_s4 + $0x30] sm:$0xff] %vm486_vm0, %v460_v39  ;;  %v336_v47 = vadd.f32 %v900_v56, %v335_v45 }
 0x10e   : > { %509 = vst.msk [vmem:[%s909_s4 + $0xb0] sm:$0xff] %vm486_vm0, %v476_v40  ;;  %v416_v48 = vadd.f32 %v900_v56, %v415_v46  ;;  %v463_v49 = vmax.f32 %v341_v43, 0.0 }
 0x10f   : > { %v479_v50 = vmax.f32 %v421_v44, 0.0  ;;  %v462_v51 = vmax.f32 %v336_v47, 0.0  ;;  %v684_v53 = vpop.f32.mrb[10].mxu0 }
 0x110   : > { %v478_v52 = vmax.f32 %v416_v48, 0.0  ;;  %v708_v54 = vpop.f32.mrb[10].mxu1  ;;  %496 = vst.msk [vmem:[%s909_s4 + $0x48] sm:$0xff] %vm486_vm0, %v463_v49  ;;  %v351_v55 = vadd.f32 %v684_v53, %v900_v56  ;;  %v345_v58 = vpop.f32.mrb[11].mxu0 }
 0x111   : > { %512 = vst.msk [vmem:[%s909_s4 + $0xc8] sm:$0xff] %vm486_vm0, %v479_v50  ;;  %v431_v57 = vadd.f32 %v708_v54, %v900_v56  ;;  %v425_v59 = vpop.f32.mrb[11].mxu1  ;;  %495 = vst.msk [vmem:[%s909_s4 + $0x40] sm:$0xff] %vm486_vm0, %v462_v51  ;;  %v346_v60 = vadd.f32 %v900_v56, %v345_v58 }
 0x112   : > { %511 = vst.msk [vmem:[%s909_s4 + $0xc0] sm:$0xff] %vm486_vm0, %v478_v52  ;;  %v426_v61 = vadd.f32 %v900_v56, %v425_v59  ;;  %v465_v62 = vmax.f32 %v351_v55, 0.0 }
 0x113   : > { %v481_v63 = vmax.f32 %v431_v57, 0.0  ;;  %v464_v0 = vmax.f32 %v346_v60, 0.0  ;;  %v687_v2 = vpop.f32.mrb[12].mxu0 }
 0x114   : > { %v480_v1 = vmax.f32 %v426_v61, 0.0  ;;  %v711_v3 = vpop.f32.mrb[12].mxu1  ;;  %498 = vst.msk [vmem:[%s909_s4 + $0x58] sm:$0xff] %vm486_vm0, %v465_v62  ;;  %v361_v4 = vadd.f32 %v687_v2, %v900_v56  ;;  %v355_v6 = vpop.f32.mrb[13].mxu0 }
 0x115   : > { %514 = vst.msk [vmem:[%s909_s4 + $0xd8] sm:$0xff] %vm486_vm0, %v481_v63  ;;  %v441_v5 = vadd.f32 %v711_v3, %v900_v56  ;;  %v435_v7 = vpop.f32.mrb[13].mxu1  ;;  %497 = vst.msk [vmem:[%s909_s4 + $0x50] sm:$0xff] %vm486_vm0, %v464_v0  ;;  %v356_v8 = vadd.f32 %v900_v56, %v355_v6 }
 0x116   : > { %513 = vst.msk [vmem:[%s909_s4 + $0xd0] sm:$0xff] %vm486_vm0, %v480_v1  ;;  %v436_v9 = vadd.f32 %v900_v56, %v435_v7  ;;  %v467_v10 = vmax.f32 %v361_v4, 0.0 }
 0x117   : > { %v483_v11 = vmax.f32 %v441_v5, 0.0  ;;  %v466_v12 = vmax.f32 %v356_v8, 0.0  ;;  %v690_v14 = vpop.f32.mrb[14].mxu0 }
 0x118   : > { %v482_v13 = vmax.f32 %v436_v9, 0.0  ;;  %v714_v15 = vpop.f32.mrb[14].mxu1  ;;  %500 = vst.msk [vmem:[%s909_s4 + $0x68] sm:$0xff] %vm486_vm0, %v467_v10  ;;  %v371_v16 = vadd.f32 %v690_v14, %v900_v56  ;;  %v365_v18 = vpop.f32.mrb[15].mxu0 }
 0x119   : > { %516 = vst.msk [vmem:[%s909_s4 + $0xe8] sm:$0xff] %vm486_vm0, %v483_v11  ;;  %v451_v17 = vadd.f32 %v714_v15, %v900_v56  ;;  %v445_v19 = vpop.f32.mrb[15].mxu1  ;;  %499 = vst.msk [vmem:[%s909_s4 + $0x60] sm:$0xff] %vm486_vm0, %v466_v12  ;;  %v366_v20 = vadd.f32 %v900_v56, %v365_v18 }
 0x11a   : > { %515 = vst.msk [vmem:[%s909_s4 + $0xe0] sm:$0xff] %vm486_vm0, %v482_v13  ;;  %v446_v21 = vadd.f32 %v900_v56, %v445_v19  ;;  %v469_v22 = vmax.f32 %v371_v16, 0.0 }
 0x11b   : > { %v485_v23 = vmax.f32 %v451_v17, 0.0  ;;  %v468_v24 = vmax.f32 %v366_v20, 0.0 }
 0x11c   : > { %v484_v25 = vmax.f32 %v446_v21, 0.0  ;;  %502 = vst.msk [vmem:[%s909_s4 + $0x78] sm:$0xff] %vm486_vm0, %v469_v22 }
 0x11d   : > { %518 = vst.msk [vmem:[%s909_s4 + $0xf8] sm:$0xff] %vm486_vm0, %v485_v23  ;;  %501 = vst.msk [vmem:[%s909_s4 + $0x70] sm:$0xff] %vm486_vm0, %v468_v24 }
 0x11e   : > { %517 = vst.msk [vmem:[%s909_s4 + $0xf0] sm:$0xff] %vm486_vm0, %v484_v25 }
 0x11f PF: > { %s13_s12 = sadd.s32 1, %s777_s12  }
 0x120   : > { %p10_p4 = scmp.ge.s32.totalorder %s13_s12, 4  }
 0x122   :  { %12 = sbr.rel (!%p10_p4) target bundleno = 1 (0x1), region = 62 }

</bundles_post_ra>
